<compile_context>
chip_gen: v7x
topology: tpu7x:2x2x1
jax: 0.10.0
libtpu: 0.0.40
codegen_flags: <defaults>
</compile_context>

<pallas_src>
import jax
import jax.numpy as jnp
from jax.experimental import pallas as pl
from jax.experimental.pallas import tpu as pltpu

_LANES = 128


def _make_kernel(TB, TNp, CHUNK, PG, PR, R, p):
    """Build the ReadOut kernel for static tile sizes (closed over)."""
    n_chunks = TNp // CHUNK

    def kernel(x_ref, w1_ref, b1_ref, w2_ref, b2_ref, w3_ref, b3_ref,
               w4_ref, b4_ref, y_ref, acc_ref):
        n_idx = pl.program_id(1)

        @pl.when(n_idx == 0)
        def _init():
            acc_ref[...] = jnp.zeros_like(acc_ref)

        # Residents (tiny); hoist loads out of the chunk loop.
        w1 = w1_ref[...]                      # (PG, PR) bf16, block-diagonal W1
        b1 = b1_ref[...]                      # (1,  PR) f32, p-tiled bias

        # ---- layer 1: relu(x @ W1 + b1), summed over this tile's atoms ------
        # Chunked over packed-atom rows so the f32 intermediate stays small.
        for c in range(n_chunks):
            xt = x_ref[:, c * CHUNK:(c + 1) * CHUNK, :]     # (TB, CHUNK, PG) bf16
            xt = xt.reshape(TB * CHUNK, PG)                 # leading-dim merge
            h = jnp.dot(xt, w1, preferred_element_type=jnp.float32)
            h = jnp.maximum(h + b1, 0.0)                    # bias + relu (f32)
            acc_ref[...] += h.reshape(TB, CHUNK, PR).sum(axis=1)

        # ---- epilogue: only on the last atom tile ----------------------------
        @pl.when(n_idx == pl.num_programs(1) - 1)
        def _finalize():
            # Fold the p packed lane segments of width R back into (TB, R).
            a = acc_ref[...]
            folded = a[:, 0:R]
            for i in range(1, p):
                folded = folded + a[:, i * R:(i + 1) * R]

            emb = jax.nn.sigmoid(folded)                    # (TB, R)

            y = jnp.dot(emb, w2_ref[...], preferred_element_type=jnp.float32)
            y = jnp.maximum(y + b2_ref[...], 0.0)           # relu
            y = jnp.dot(y, w3_ref[...], preferred_element_type=jnp.float32)
            y = jnp.tanh(y + b3_ref[...])                   # tanh

            # R -> 1 projection as broadcast-multiply + lane reduction
            # (a 1-column MXU matmul would waste the array).  w4_ref is (1, R).
            out = jnp.sum(y * w4_ref[...], axis=-1, keepdims=True) + b4_ref[...]

            # Lane-dense store: broadcast (TB, 1) across all 128 lanes.
            y_ref[...] = jnp.broadcast_to(out, y_ref.shape).astype(y_ref.dtype)

    return kernel


def _pick_tile(dim, target):
    """Largest multiple-of-8 divisor of `dim` that is <= target, else dim."""
    if dim <= target:
        return dim
    t = (target // 8) * 8
    while t >= 8:
        if dim % t == 0:
            return t
        t -= 8
    return dim


def _pick_tb(batch, target):
    """Batch tile: prefer a multiple-of-8 divisor that leaves >= 2 grid steps
    along the 'parallel' batch axis (so v7x's two TensorCores both get work)."""
    t = (min(target, batch // 2) // 8) * 8
    while t >= 8:
        if batch % t == 0:
            return t
        t -= 8
    # TODO(synk): for tiny B on v7x, split the atom reduction across the two
    # TensorCores instead (two partial accumulators + a combine step).
    return batch


def readout_forward(inp, params, *, tb_target=8, tn_rows_target=8192,
                    chunk_rows_target=256, x_buffers=2):
    """inp: (B, N, G) float32.  params: dict from init_params.  Returns (B, 1)."""
    B, N, G = inp.shape
    R = params["w1"].shape[1]

    # --- atom packing: p atoms per 128-wide MXU row ---------------------------
    p = 1
    for cand in range(max(1, _LANES // G), 0, -1):
        if N % cand == 0:
            p = cand
            break
    Np, PG, PR = N // p, p * G, p * R

    # --- tile sizes ------------------------------------------------------------
    TB = _pick_tb(B, tb_target)
    TNp = _pick_tile(Np, max(8, tn_rows_target // TB))     # packed rows / tile
    CHUNK = _pick_tile(TNp, max(8, chunk_rows_target // TB))
    grid = (B // TB, Np // TNp)

    # --- operands --------------------------------------------------------------
    # Packed x, streamed in bf16 (halves the dominant HBM stream; f32 accumulate
    # happens on the MXU).  (B,N,G) -> (B,Np,p*G) is a contiguous reshape.
    x_packed = inp.reshape(B, Np, PG).astype(jnp.bfloat16)
    # Block-diagonal W1 = kron(I_p, W1) and p-tiled bias, built once host-side.
    w1_blk = jnp.kron(jnp.eye(p, dtype=params["w1"].dtype), params["w1"])
    w1_blk = w1_blk.astype(jnp.bfloat16)                    # (PG, PR)
    b1_tiled = jnp.tile(params["b1"], (1, p))               # (1, PR) f32
    # w4 stored (R, 1); present it lane-major (1, R) (zero-cost host reshape).
    w4_row = params["w4"].reshape(1, R)

    # --- specs -----------------------------------------------------------------
    resident = pl.BlockSpec(memory_space=pltpu.MemorySpace.VMEM)
    x_kwargs = {} if x_buffers == 2 else dict(pipeline_mode=pl.Buffered(x_buffers))
    x_spec = pl.BlockSpec((TB, TNp, PG), lambda b, n: (b, n, 0), **x_kwargs)
    in_specs = [x_spec,
                resident, resident,     # w1_blk, b1_tiled
                resident, resident,     # w2, b2
                resident, resident,     # w3, b3
                resident, resident]     # w4_row, b4
    out_specs = pl.BlockSpec((TB, _LANES), lambda b, n: (b, 0))

    # --- VMEM budget: count double-buffering once, include the layer-1 chunk
    #     intermediate, cap well below v7x's 64 MiB physical VMEM ---------------
    x_tile = x_buffers * TB * TNp * PG * 2      # bf16 stream buffers
    h_chunk = TB * CHUNK * PR * 4               # f32 layer-1 intermediate
    acc_bytes = TB * PR * 4
    w_bytes = PG * PR * 2 + PR * 4 + 2 * (R * R + R) * 4 + (R + 1) * 4
    out_bytes = 2 * TB * _LANES * 4
    need = x_tile + h_chunk + acc_bytes + w_bytes + out_bytes
    cp_kwargs = {}
    if need + (4 << 20) > (16 << 20):           # raise only when required
        cp_kwargs["vmem_limit_bytes"] = int(min(need + (4 << 20), 48 << 20))

    compiler_params = pltpu.CompilerParams(
        dimension_semantics=("parallel", "arbitrary"), **cp_kwargs)

    cost = pl.CostEstimate(
        flops=2 * B * N * G * R + 4 * B * R * R + 2 * B * R,
        transcendentals=2 * B * R,
        bytes_accessed=2 * B * N * G + 2 * PG * PR
        + 4 * (PR + 2 * R * R + 4 * R + 1 + B * _LANES),
    )

    kernel = _make_kernel(TB, TNp, CHUNK, PG, PR, R, p)
    out_padded = pl.pallas_call(
        kernel,
        out_shape=jax.ShapeDtypeStruct((B, _LANES), jnp.float32),
        grid=grid,
        in_specs=in_specs,
        out_specs=out_specs,
        scratch_shapes=[pltpu.VMEM((TB, PR), jnp.float32)],
        compiler_params=compiler_params,
        cost_estimate=cost,
    )(
        x_packed,
        w1_blk, b1_tiled,
        params["w2"], params["b2"],
        params["w3"], params["b3"],
        w4_row, params["b4"],
    )
    return out_padded[:, :1]                    # lane-dense slab -> (B, 1)


def init_params(key, gcn_dim, readout_dim):
    """Deterministic init mimicking PyTorch Linear default (uniform +-1/sqrt(fan_in))."""
    ks = jax.random.split(key, 8)

    def lin(kw, kb, fan_in, fan_out):
        bound = 1.0 / jnp.sqrt(fan_in)
        w = jax.random.uniform(kw, (fan_in, fan_out), jnp.float32, -bound, bound)
        b = jax.random.uniform(kb, (1, fan_out), jnp.float32, -bound, bound)
        return w, b

    w1, b1 = lin(ks[0], ks[1], gcn_dim, readout_dim)
    w2, b2 = lin(ks[2], ks[3], readout_dim, readout_dim)
    w3, b3 = lin(ks[4], ks[5], readout_dim, readout_dim)
    w4, b4 = lin(ks[6], ks[7], readout_dim, 1)
    return dict(w1=w1, b1=b1, w2=w2, b2=b2, w3=w3, b3=b3, w4=w4, b4=b4)


def readout_reference(inp, prm, *, layer1_dtype=jnp.float32):
    """Pure-JAX reference.  layer1_dtype=bfloat16 matches the kernel's bf16
    layer-1 matmul (f32 accumulation); float32 gives the exact PyTorch math."""
    x = inp.astype(layer1_dtype)
    w1 = prm["w1"].astype(layer1_dtype)
    h = jnp.dot(x, w1, preferred_element_type=jnp.float32) + prm["b1"][0]
    emb = jax.nn.sigmoid(jax.nn.relu(h).sum(axis=1))
    y = jax.nn.relu(emb @ prm["w2"] + prm["b2"][0])
    y = jnp.tanh(y @ prm["w3"] + prm["b3"][0])
    return y @ prm["w4"] + prm["b4"][0]


if __name__ == "__main__":
    B, N, GCN_DIM, READOUT_DIM = 2, 256, 32, 32

    key = jax.random.PRNGKey(0)
    k_inp, k_prm = jax.random.split(key)

    # Modest input scale keeps the pre-sigmoid atom-sum out of deep saturation
    # so the checks stay sensitive to layer-1 / accumulation bugs.
    inp = 0.1 * jax.random.normal(k_inp, (B, N, GCN_DIM), dtype=jnp.float32)
    params = init_params(k_prm, GCN_DIM, READOUT_DIM)

    ref_matched = readout_reference(inp, params, layer1_dtype=jnp.bfloat16)
    ref_f32 = readout_reference(inp, params)

    # Overrides so the toy shapes exercise every code path: p=4 atoms/row ->
    # Np=64 packed rows; TNp=32 -> 2 grid steps over atoms (accumulator
    # init/finalize); CHUNK=16 -> 2 in-kernel layer-1 chunks per step.
    out = readout_forward(inp, params, tn_rows_target=64, chunk_rows_target=32)
    out = jax.block_until_ready(out)
    assert out.shape == (B, 1), out.shape
    assert jnp.allclose(out, ref_matched, atol=1e-4, rtol=1e-4), (out, ref_matched)
    assert jnp.allclose(out, ref_f32, atol=5e-2, rtol=5e-2), (out, ref_f32)

    # Default tiling path (single atom tile per batch tile, single chunk).
    out2 = jax.block_until_ready(readout_forward(inp, params))
    assert jnp.allclose(out2, ref_matched, atol=1e-4, rtol=1e-4), (out2, ref_matched)

    print("KERNEL_OK")
</pallas_src>

<mosaic_0001>
module attributes {stable_mosaic.version = 11 : i64} {
  func.func @kernel(%arg0: i32, %arg1: i32, %arg2: memref<2x32x128xbf16, #tpu.memory_space<vmem>>, %arg3: memref<128x128xbf16, #tpu.memory_space<vmem>>, %arg4: memref<1x128xf32, #tpu.memory_space<vmem>>, %arg5: memref<32x32xf32, #tpu.memory_space<vmem>>, %arg6: memref<1x32xf32, #tpu.memory_space<vmem>>, %arg7: memref<32x32xf32, #tpu.memory_space<vmem>>, %arg8: memref<1x32xf32, #tpu.memory_space<vmem>>, %arg9: memref<1x32xf32, #tpu.memory_space<vmem>>, %arg10: memref<1x1xf32, #tpu.memory_space<vmem>>, %arg11: memref<2x128xf32, #tpu.memory_space<vmem>>, %arg12: memref<2x128xf32, #tpu.memory_space<vmem>>) attributes {dimension_semantics = [#tpu.dimension_semantics<parallel>, #tpu.dimension_semantics<arbitrary>], iteration_bounds = array<i64: 1, 2>, scalar_prefetch = 0 : i64, scratch_operands = 1 : i64, tpu.core_type = #tpu.core_type<tc>, window_params = [{transform_indices = @transform_0, window_bounds = array<i64: 2, 32, 128>}, {pipeline_mode = #tpu.pipeline_mode<synchronous>, transform_indices = @transform_1, window_bounds = array<i64: 128, 128>}, {pipeline_mode = #tpu.pipeline_mode<synchronous>, transform_indices = @transform_2, window_bounds = array<i64: 1, 128>}, {pipeline_mode = #tpu.pipeline_mode<synchronous>, transform_indices = @transform_3, window_bounds = array<i64: 32, 32>}, {pipeline_mode = #tpu.pipeline_mode<synchronous>, transform_indices = @transform_4, window_bounds = array<i64: 1, 32>}, {pipeline_mode = #tpu.pipeline_mode<synchronous>, transform_indices = @transform_5, window_bounds = array<i64: 32, 32>}, {pipeline_mode = #tpu.pipeline_mode<synchronous>, transform_indices = @transform_6, window_bounds = array<i64: 1, 32>}, {pipeline_mode = #tpu.pipeline_mode<synchronous>, transform_indices = @transform_7, window_bounds = array<i64: 1, 32>}, {pipeline_mode = #tpu.pipeline_mode<synchronous>, transform_indices = @transform_8, window_bounds = array<i64: 1, 1>}, {transform_indices = @transform_9, window_bounds = array<i64: 2, 128>}]} {
    %c0_i32 = arith.constant 0 : i32
    %0 = arith.cmpi eq, %arg1, %c0_i32 : i32
    %1 = arith.extui %0 : i1 to i32
    %c0_i32_0 = arith.constant 0 : i32
    %2 = arith.cmpi ne, %1, %c0_i32_0 : i32
    scf.if %2 {
      %cst_23 = arith.constant 0.000000e+00 : f32
      %32 = vector.broadcast %cst_23 : f32 to vector<2x128xf32>
      %c0_24 = arith.constant 0 : index
      %c0_25 = arith.constant 0 : index
      %33 = vector.load %arg12[%c0_24, %c0_25] : memref<2x128xf32, #tpu.memory_space<vmem>>, vector<2x128xf32>
      tpu.vector_store %arg12[%c0_24, %c0_25], %32 {strides = array<i32>} : memref<2x128xf32, #tpu.memory_space<vmem>>, vector<2x128xf32>,
    } else {
    }
    %c0 = arith.constant 0 : index
    %c0_1 = arith.constant 0 : index
    %3 = vector.load %arg3[%c0, %c0_1] : memref<128x128xbf16, #tpu.memory_space<vmem>>, vector<128x128xbf16>
    %c0_2 = arith.constant 0 : index
    %c0_3 = arith.constant 0 : index
    %4 = vector.load %arg4[%c0_2, %c0_3] : memref<1x128xf32, #tpu.memory_space<vmem>>, vector<1x128xf32>
    %c0_4 = arith.constant 0 : index
    %c0_5 = arith.constant 0 : index
    %c0_6 = arith.constant 0 : index
    %5 = vector.load %arg2[%c0_4, %c0_5, %c0_6] : memref<2x32x128xbf16, #tpu.memory_space<vmem>>, vector<2x16x128xbf16>
    %6 = vector.shape_cast %5 : vector<2x16x128xbf16> to vector<32x128xbf16>
    %cst = arith.constant dense<0.000000e+00> : vector<32x128xf32>
    %7 = tpu.matmul %6, %3, %cst {dimension_numbers = #tpu.dot_dimension_numbers<[1], [0], [0], [1], [0, 0, 1, 1], [], []>} : vector<32x128xbf16>, vector<128x128xbf16>, vector<32x128xf32> -> vector<32x128xf32>
    %8 = vector.broadcast %4 : vector<1x128xf32> to vector<32x128xf32>
    %9 = arith.addf %7, %8 : vector<32x128xf32>
    %cst_7 = arith.constant 0.000000e+00 : f32
    %10 = vector.broadcast %cst_7 : f32 to vector<32x128xf32>
    %11 = arith.maximumf %9, %10 : vector<32x128xf32>
    %c0_8 = arith.constant 0 : index
    %c0_9 = arith.constant 0 : index
    %12 = vector.load %arg12[%c0_8, %c0_9] : memref<2x128xf32, #tpu.memory_space<vmem>>, vector<2x128xf32>
    %13 = vector.shape_cast %11 : vector<32x128xf32> to vector<2x16x128xf32>
    %cst_10 = arith.constant dense<0.000000e+00> : vector<2x128xf32>
    %14 = vector.multi_reduction <add>, %13, %cst_10 [1] : vector<2x16x128xf32> to vector<2x128xf32>
    %15 = arith.addf %12, %14 : vector<2x128xf32>
    %c0_11 = arith.constant 0 : index
    %c0_12 = arith.constant 0 : index
    %16 = vector.load %arg12[%c0_11, %c0_12] : memref<2x128xf32, #tpu.memory_space<vmem>>, vector<2x128xf32>
    tpu.vector_store %arg12[%c0_11, %c0_12], %15 {strides = array<i32>} : memref<2x128xf32, #tpu.memory_space<vmem>>, vector<2x128xf32>,
    %c0_13 = arith.constant 0 : index
    %c16 = arith.constant 16 : index
    %c0_14 = arith.constant 0 : index
    %17 = vector.load %arg2[%c0_13, %c16, %c0_14] : memref<2x32x128xbf16, #tpu.memory_space<vmem>>, vector<2x16x128xbf16>
    %18 = vector.shape_cast %17 : vector<2x16x128xbf16> to vector<32x128xbf16>
    %cst_15 = arith.constant dense<0.000000e+00> : vector<32x128xf32>
    %19 = tpu.matmul %18, %3, %cst_15 {dimension_numbers = #tpu.dot_dimension_numbers<[1], [0], [0], [1], [0, 0, 1, 1], [], []>} : vector<32x128xbf16>, vector<128x128xbf16>, vector<32x128xf32> -> vector<32x128xf32>
    %20 = vector.broadcast %4 : vector<1x128xf32> to vector<32x128xf32>
    %21 = arith.addf %19, %20 : vector<32x128xf32>
    %cst_16 = arith.constant 0.000000e+00 : f32
    %22 = vector.broadcast %cst_16 : f32 to vector<32x128xf32>
    %23 = arith.maximumf %21, %22 : vector<32x128xf32>
    %c0_17 = arith.constant 0 : index
    %c0_18 = arith.constant 0 : index
    %24 = vector.load %arg12[%c0_17, %c0_18] : memref<2x128xf32, #tpu.memory_space<vmem>>, vector<2x128xf32>
    %25 = vector.shape_cast %23 : vector<32x128xf32> to vector<2x16x128xf32>
    %cst_19 = arith.constant dense<0.000000e+00> : vector<2x128xf32>
    %26 = vector.multi_reduction <add>, %25, %cst_19 [1] : vector<2x16x128xf32> to vector<2x128xf32>
    %27 = arith.addf %24, %26 : vector<2x128xf32>
    %c0_20 = arith.constant 0 : index
    %c0_21 = arith.constant 0 : index
    %28 = vector.load %arg12[%c0_20, %c0_21] : memref<2x128xf32, #tpu.memory_space<vmem>>, vector<2x128xf32>
    tpu.vector_store %arg12[%c0_20, %c0_21], %27 {strides = array<i32>} : memref<2x128xf32, #tpu.memory_space<vmem>>, vector<2x128xf32>,
    %c1_i32 = arith.constant 1 : i32
    %29 = arith.cmpi eq, %arg1, %c1_i32 : i32
    %30 = arith.extui %29 : i1 to i32
    %c0_i32_22 = arith.constant 0 : i32
    %31 = arith.cmpi ne, %30, %c0_i32_22 : i32
    scf.if %31 {
      %c0_23 = arith.constant 0 : index
      %c0_24 = arith.constant 0 : index
      %32 = vector.load %arg12[%c0_23, %c0_24] : memref<2x128xf32, #tpu.memory_space<vmem>>, vector<2x128xf32>
      %33 = vector.extract_strided_slice %32 {offsets = [0, 0], sizes = [2, 32], strides = [1, 1]} : vector<2x128xf32> to vector<2x32xf32>
      %34 = vector.extract_strided_slice %32 {offsets = [0, 32], sizes = [2, 32], strides = [1, 1]} : vector<2x128xf32> to vector<2x32xf32>
      %35 = arith.addf %33, %34 : vector<2x32xf32>
      %36 = vector.extract_strided_slice %32 {offsets = [0, 64], sizes = [2, 32], strides = [1, 1]} : vector<2x128xf32> to vector<2x32xf32>
      %37 = arith.addf %35, %36 : vector<2x32xf32>
      %38 = vector.extract_strided_slice %32 {offsets = [0, 96], sizes = [2, 32], strides = [1, 1]} : vector<2x128xf32> to vector<2x32xf32>
      %39 = arith.addf %37, %38 : vector<2x32xf32>
      %40 = arith.negf %39 : vector<2x32xf32>
      %41 = math.exp %40 : vector<2x32xf32>
      %cst_25 = arith.constant 1.000000e+00 : f32
      %42 = vector.broadcast %cst_25 : f32 to vector<2x32xf32>
      %43 = arith.addf %42, %41 : vector<2x32xf32>
      %44 = arith.divf %42, %43 : vector<2x32xf32>
      %c0_26 = arith.constant 0 : index
      %c0_27 = arith.constant 0 : index
      %45 = vector.load %arg5[%c0_26, %c0_27] : memref<32x32xf32, #tpu.memory_space<vmem>>, vector<32x32xf32>
      %cst_28 = arith.constant dense<0.000000e+00> : vector<2x32xf32>
      %46 = tpu.matmul %44, %45, %cst_28 {dimension_numbers = #tpu.dot_dimension_numbers<[1], [0], [0], [1], [0, 0, 1, 1], [], []>} : vector<2x32xf32>, vector<32x32xf32>, vector<2x32xf32> -> vector<2x32xf32>
      %c0_29 = arith.constant 0 : index
      %c0_30 = arith.constant 0 : index
      %47 = vector.load %arg6[%c0_29, %c0_30] : memref<1x32xf32, #tpu.memory_space<vmem>>, vector<1x32xf32>
      %48 = vector.broadcast %47 : vector<1x32xf32> to vector<2x32xf32>
      %49 = arith.addf %46, %48 : vector<2x32xf32>
      %cst_31 = arith.constant 0.000000e+00 : f32
      %50 = vector.broadcast %cst_31 : f32 to vector<2x32xf32>
      %51 = arith.maximumf %49, %50 : vector<2x32xf32>
      %c0_32 = arith.constant 0 : index
      %c0_33 = arith.constant 0 : index
      %52 = vector.load %arg7[%c0_32, %c0_33] : memref<32x32xf32, #tpu.memory_space<vmem>>, vector<32x32xf32>
      %cst_34 = arith.constant dense<0.000000e+00> : vector<2x32xf32>
      %53 = tpu.matmul %51, %52, %cst_34 {dimension_numbers = #tpu.dot_dimension_numbers<[1], [0], [0], [1], [0, 0, 1, 1], [], []>} : vector<2x32xf32>, vector<32x32xf32>, vector<2x32xf32> -> vector<2x32xf32>
      %c0_35 = arith.constant 0 : index
      %c0_36 = arith.constant 0 : index
      %54 = vector.load %arg8[%c0_35, %c0_36] : memref<1x32xf32, #tpu.memory_space<vmem>>, vector<1x32xf32>
      %55 = vector.broadcast %54 : vector<1x32xf32> to vector<2x32xf32>
      %56 = arith.addf %53, %55 : vector<2x32xf32>
      %57 = math.tanh %56 : vector<2x32xf32>
      %c0_37 = arith.constant 0 : index
      %c0_38 = arith.constant 0 : index
      %58 = vector.load %arg9[%c0_37, %c0_38] : memref<1x32xf32, #tpu.memory_space<vmem>>, vector<1x32xf32>
      %59 = vector.broadcast %58 : vector<1x32xf32> to vector<2x32xf32>
      %60 = arith.mulf %57, %59 : vector<2x32xf32>
      %cst_39 = arith.constant dense<0.000000e+00> : vector<2xf32>
      %61 = vector.multi_reduction <add>, %60, %cst_39 [1] : vector<2x32xf32> to vector<2xf32>
      %62 = vector.shape_cast %61 : vector<2xf32> to vector<2x1xf32>
      %c0_40 = arith.constant 0 : index
      %c0_41 = arith.constant 0 : index
      %63 = vector.load %arg10[%c0_40, %c0_41] : memref<1x1xf32, #tpu.memory_space<vmem>>, vector<1x1xf32>
      %64 = vector.broadcast %63 : vector<1x1xf32> to vector<2x1xf32>
      %65 = arith.addf %62, %64 : vector<2x1xf32>
      %66 = vector.shape_cast %65 : vector<2x1xf32> to vector<2x1xf32>
      %67 = vector.broadcast %66 : vector<2x1xf32> to vector<2x128xf32>
      %c0_42 = arith.constant 0 : index
      %c0_43 = arith.constant 0 : index
      %68 = vector.load %arg11[%c0_42, %c0_43] : memref<2x128xf32, #tpu.memory_space<vmem>>, vector<2x128xf32>
      tpu.vector_store %arg11[%c0_42, %c0_43], %67 {strides = array<i32>} : memref<2x128xf32, #tpu.memory_space<vmem>>, vector<2x128xf32>,
    } else {
    }
    return
  }
  func.func @transform_0(%arg0: i32, %arg1: i32) -> (i32, i32, i32) {
    %c0_i32 = arith.constant 0 : i32
    %c0_i32_0 = arith.constant 0 : i32
    return %arg0, %arg1, %c0_i32 : i32, i32, i32
  }
  func.func @transform_1(%arg0: i32, %arg1: i32) -> (i32, i32) {
    %c0_i32 = arith.constant 0 : i32
    %c0_i32_0 = arith.constant 0 : i32
    %c0_i32_1 = arith.constant 0 : i32
    return %c0_i32, %c0_i32_0 : i32, i32
  }
  func.func @transform_2(%arg0: i32, %arg1: i32) -> (i32, i32) {
    %c0_i32 = arith.constant 0 : i32
    %c0_i32_0 = arith.constant 0 : i32
    %c0_i32_1 = arith.constant 0 : i32
    return %c0_i32, %c0_i32_0 : i32, i32
  }
  func.func @transform_3(%arg0: i32, %arg1: i32) -> (i32, i32) {
    %c0_i32 = arith.constant 0 : i32
    %c0_i32_0 = arith.constant 0 : i32
    %c0_i32_1 = arith.constant 0 : i32
    return %c0_i32, %c0_i32_0 : i32, i32
  }
  func.func @transform_4(%arg0: i32, %arg1: i32) -> (i32, i32) {
    %c0_i32 = arith.constant 0 : i32
    %c0_i32_0 = arith.constant 0 : i32
    %c0_i32_1 = arith.constant 0 : i32
    return %c0_i32, %c0_i32_0 : i32, i32
  }
  func.func @transform_5(%arg0: i32, %arg1: i32) -> (i32, i32) {
    %c0_i32 = arith.constant 0 : i32
    %c0_i32_0 = arith.constant 0 : i32
    %c0_i32_1 = arith.constant 0 : i32
    return %c0_i32, %c0_i32_0 : i32, i32
  }
  func.func @transform_6(%arg0: i32, %arg1: i32) -> (i32, i32) {
    %c0_i32 = arith.constant 0 : i32
    %c0_i32_0 = arith.constant 0 : i32
    %c0_i32_1 = arith.constant 0 : i32
    return %c0_i32, %c0_i32_0 : i32, i32
  }
  func.func @transform_7(%arg0: i32, %arg1: i32) -> (i32, i32) {
    %c0_i32 = arith.constant 0 : i32
    %c0_i32_0 = arith.constant 0 : i32
    %c0_i32_1 = arith.constant 0 : i32
    return %c0_i32, %c0_i32_0 : i32, i32
  }
  func.func @transform_8(%arg0: i32, %arg1: i32) -> (i32, i32) {
    %c0_i32 = arith.constant 0 : i32
    %c0_i32_0 = arith.constant 0 : i32
    %c0_i32_1 = arith.constant 0 : i32
    return %c0_i32, %c0_i32_0 : i32, i32
  }
  func.func @transform_9(%arg0: i32, %arg1: i32) -> (i32, i32) {
    %c0_i32 = arith.constant 0 : i32
    %c0_i32_0 = arith.constant 0 : i32
    return %arg0, %c0_i32 : i32, i32
  }
}

</mosaic_0001>

<bundles_post_ra>
// kernel: tpu_custom_call.1
= control target key start
LH: loop header
LB: loop body
LE: loop exit
PB: predicated region body
PF: predicated region fallthrough
CT: control target
= control target key end

     0   :  { %s1783_s0 = inlined_call_operand.hbm [shape: bf16[2,64,128], index: 0, kind: input, shape index: {}]   ;;  %s1784_s1 = inlined_call_operand.hbm [shape: bf16[128,128], index: 1, kind: input, shape index: {}]   ;;  %s1785_s2 = inlined_call_operand.vmem [shape: f32[1,128], index: 2, kind: input, shape index: {}]   ;;  %s1786_s3 = inlined_call_operand.hbm [shape: f32[32,32], index: 3, kind: input, shape index: {}]   ;;  %s1787_s4 = inlined_call_operand.vmem [shape: f32[1,32], index: 4, kind: input, shape index: {}]   ;;  %s1788_s5 = inlined_call_operand.hbm [shape: f32[32,32], index: 5, kind: input, shape index: {}]   ;;  %s1789_s6 = inlined_call_operand.vmem [shape: f32[1,32], index: 6, kind: input, shape index: {}]   ;;  %s1790_s7 = inlined_call_operand.vmem [shape: f32[1,32], index: 7, kind: input, shape index: {}]   ;;  %s1791_s8 = inlined_call_operand.<no memory space> [shape: f32[1,1], index: 8, kind: input, shape index: {}]   ;;  %s1792_s9 = inlined_call_operand.hbm [shape: f32[2,128], index: 9, kind: output, shape index: {}]  }
   0x1   :  { %1801 = sst [smem:[#allocation22_spill]] %s1784_s1  ;;  %v14_v0 = vstv %s1791_s8 }
   0x2   :  { %1802 = sst [smem:[#allocation23_spill]] %s1790_s7  ;;  %15 = vst [vmem:[#allocation3] sm:$0x1] %v14_v0 }
   0x3   :  { %1803 = sst [smem:[#allocation24_spill]] %s1792_s9 }
   0x4   :  { %16 = vsyncpa [#allocation5], 0 }
   0x5   :  { %18 = vsyncpa [#allocation5 + $0x1], 0 }
   0x6   :  { %19 = vsyncpa [#allocation8], 0 }
   0x7   :  { %20 = vsyncpa [#allocation11], 0 }
   0x8   :  { %21 = vsyncpa [#allocation6], 0  ;;  %s1541_s11 = smov 0   ;;  %s1543_s12 = smov 0  }
   0x9   :  { %s1545_s13 = smov 0   ;;  %s1547_s14 = smov 0  }
   0xa   :  { %s1549_s15 = smov 0   ;;  %s1551_s16 = smov 0  }
   0xb LB: > { %s1793_s8 = sadd.s32 4294967295, %s1465_s16   ;;  %s36_s17 = sadd.s32 1, %s1461_s15  ;;  %s1465_s16 = sphi %s1551_s16, %s27_s16   ;;  %s1461_s15 = sphi %s1549_s15, %s1828_s15   ;;  %s1457_s14 = sphi %s1547_s14, %s1827_s14   ;;  %s1453_s13 = sphi %s1545_s13, %s1826_s13   ;;  %s1449_s12 = sphi %s1543_s12, %s1825_s12   ;;  %s1445_s11 = sphi %s1541_s11, %s1824_s11  }
   0xc   : > { %p37_p0 = scmp.ge.s32.totalorder %s36_s17, 2  ;;  %s48_s18 = sadd.s32 1, %s1453_s13 }
   0xd   : > { %p55_p1 = scmp.ne.s32.totalorder %s1453_s13, %s1449_s12  ;;  %p56_p2 = scmp.eq.s32.totalorder %s1465_s16, 0 }
   0xe   : > { %s1830_s17 = smov (%p37_p0, %s36_s17), 0  ;;  %p61_p4 = scmp.ne.s32.totalorder %s1449_s12, %s1445_s11 }
   0xf   : > { %1804 = sst [smem:[#allocation20_spill]] %s1830_s17  ;;  %p1577_p3 = por %p56_p2, %p55_p1 }
  0x10   : > { %s44_s20 = ssub.s32 %s1461_s15, %s1830_s17  ;;  %p1586_p5 = scmp.eq.s32.totalorder %s1793_s8, 0 }
  0x11   : > { %s1805_s19 = scalar_select %p1577_p3, 1, 0 }
  0x12   : > { %s1806_s21 = scalar_select %p1586_p5, 1, 0 }
  0x13   : > { %p46_p6 = scmp.eq.s32.totalorder %s44_s20, 0  ;;  %p1016_p7 = scmp.ge.s32.totalorder %s1465_s16, 1 }
  0x14   : > { %p1593_p8 = por %p1586_p5, %p61_p4  ;;  %p266_p9 = scmp.lt.s32.totalorder %s1465_s16, 3 }
  0x15   : > { %s1599_s23 = scalar_select %p46_p6, %s1453_s13, %s48_s18  }
  0x16   : > { %s1807_s22 = scalar_select %p1593_p8, 1, 0 }
  0x17   : > { %1808 = sst [smem:[#allocation21_spill]] %s1599_s23  ;;  %p1601_p10 = pnand %p1016_p7, %p266_p9 }
  0x18   : > { %s1467_s25 = smov [#allocation7]   ;;  %s1468_s28 = smov [#allocation9]  }
  0x19   : > { %s1809_s24 = scalar_select %p1601_p10, 1, 0 }
  0x1a   : > { %p1187_p11 = pneg %p1601_p10  ;;  %s278_s26 = sshll.u32 %s1467_s25, 4  ;;  %s279_s26 = int_to_ptr.vmem [resolvable:$true] %s278_s26 }
  0x1b   : > { %s294_s29 = sshll.u32 %s1468_s28, 4  ;;  %s1811_s1 = sld [smem:[#allocation22_spill]]  ;;  %s1613_s29 = int_to_ptr.vmem [resolvable:$true] %s294_s29 }
  0x1c   : > { %p1609_p12 = pnand %p1187_p11, %p1586_p5 }
  0x1e   : > { %p1623_p0 = pneg %p1609_p12 }
  0x21   : > { %s1293_s11 = scalar_lea.hbm %s1811_s1, 1024 }
  0x22   : > { %p1294_p13 = scmp.ne.s32.totalorder %s1811_s1, %s1293_s11  ;;  %p1300_p4 = scmp.lt.u32.totalorder %s1293_s11, %s1811_s1 }
  0x24   : > { %p1296_p1 = pnand %p1623_p0, %p1294_p13 }
  0x26   : > { %p1297_p2 = pneg %p1296_p1 }
  0x28   : > { %p1302_p6 = pnand %p1300_p4, %p1297_p2 }
  0x2a   : > { %1305 = shalt.err (!%p1302_p6)
}
  0x2b   : > { %s1306_s30 = scalar_lea.vmem %s279_s26, 1024  ;;  %p1314_p5 = scmp.lt.s32.totalorder %s279_s26, %s279_s26 }
  0x2c   : > { %p1307_p7 = scmp.ne.s32.totalorder %s279_s26, %s1306_s30  ;;  %p1315_p8 = scmp.lt.s32.totalorder %s1306_s30, %s1306_s30 }
  0x2e   : > { %p1309_p9 = pnand %p1307_p7, %p1623_p0  ;;  %p1316_p10 = por %p1315_p8, %p1314_p5 }
  0x30   : > { %p1310_p11 = pneg %p1309_p9 }
  0x32   : > { %p1317_p3 = pnand %p1316_p10, %p1310_p11 }
  0x34   : > { %1320 = shalt.err (!%p1317_p3)
}
  0x35   : > { %s1469_s10 = smov 64   ;;  %s1470_s18 = smov 4  }
  0x36   : > { %1190 = dma.hbm_to_vmem [thread:$0]  (!%p1609_p12), %s1811_s1, 1024, %s279_s26, [#allocation8], %s1469_s10, %s1469_s10, %s1470_s18  }
  0x37   : > { %s1321_s17 = scalar_lea.hbm %s1786_s3, 512 }
  0x38   : > { %p1322_p13 = scmp.ne.s32.totalorder %s1786_s3, %s1321_s17  ;;  %p1328_p8 = scmp.lt.u32.totalorder %s1321_s17, %s1786_s3 }
  0x3a   : > { %p1324_p5 = pnand %p1322_p13, %p1623_p0 }
  0x3c   : > { %p1325_p3 = pneg %p1324_p5 }
  0x3e   : > { %p1330_p10 = pnand %p1328_p8, %p1325_p3 }
  0x40   : > { %1333 = shalt.err (!%p1330_p10)
}
  0x41   : > { %s1334_s26 = scalar_lea.vmem %s1613_s29, 512  ;;  %p1342_p6 = scmp.lt.s32.totalorder %s1613_s29, %s1613_s29 }
  0x42   : > { %p1335_p1 = scmp.ne.s32.totalorder %s1613_s29, %s1334_s26  ;;  %p1343_p7 = scmp.lt.s32.totalorder %s1334_s26, %s1334_s26 }
  0x44   : > { %p1337_p2 = pnand %p1335_p1, %p1623_p0  ;;  %p1344_p9 = por %p1343_p7, %p1342_p6 }
  0x46   : > { %p1338_p4 = pneg %p1337_p2 }
  0x48   : > { %p1345_p11 = pnand %p1344_p9, %p1338_p4 }
  0x4a   : > { %1348 = shalt.err (!%p1345_p11)
}
  0x4b   : > { %s1471_s9 = smov 128   ;;  %s1472_s7 = smov 8  }
  0x4c   : > { %1193 = dma.hbm_to_vmem [thread:$0]  (!%p1609_p12), %s1786_s3, 512, %s1613_s29, [#allocation8], %s1471_s9, %s1471_s9, %s1472_s7  }
  0x4d   : > { %s1473_s10 = smov [#allocation10]   ;;  %s1349_s20 = scalar_lea.hbm %s1788_s5, 512 }
  0x4e   : > { %s310_s18 = sshll.u32 %s1473_s10, 4  ;;  %p1350_p13 = scmp.ne.s32.totalorder %s1788_s5, %s1349_s20  ;;  %s311_s18 = int_to_ptr.vmem [resolvable:$true] %s310_s18 }
  0x4f   : > { %p1356_p8 = scmp.lt.u32.totalorder %s1349_s20, %s1788_s5 }
  0x50   : > { %p1352_p5 = pnand %p1350_p13, %p1623_p0 }
  0x52   : > { %p1353_p3 = pneg %p1352_p5 }
  0x54   : > { %p1358_p10 = pnand %p1356_p8, %p1353_p3 }
  0x56   : > { %1361 = shalt.err (!%p1358_p10)
}
  0x57   : > { %s1362_s29 = scalar_lea.vmem %s311_s18, 512  ;;  %p1370_p6 = scmp.lt.s32.totalorder %s311_s18, %s311_s18 }
  0x58   : > { %p1363_p1 = scmp.ne.s32.totalorder %s311_s18, %s1362_s29  ;;  %p1371_p7 = scmp.lt.s32.totalorder %s1362_s29, %s1362_s29 }
  0x5a   : > { %p1365_p2 = pnand %p1363_p1, %p1623_p0  ;;  %p1372_p9 = por %p1371_p7, %p1370_p6 }
  0x5c   : > { %p1366_p4 = pneg %p1365_p2 }
  0x5e   : > { %p1373_p11 = pnand %p1372_p9, %p1366_p4 }
  0x60   : > { %1376 = shalt.err (!%p1373_p11)
}
  0x61   : > { %1196 = dma.hbm_to_vmem [thread:$0]  (!%p1609_p12), %s1788_s5, 512, %s311_s18, [#allocation11], %s1471_s9, %s1471_s9, %s1472_s7  }
  0x62   : > { %p1020_p13 = scmp.ge.s32.totalorder %s1465_s16, 2 }
  0x64   : > { %329 = sbr.rel (%p1020_p13) target bundleno = 121 (0x79), region = 48 }
  0x6b   : > { %s333_s1 = sand.u32 1, %s1453_s13   ;;  %s1057_s10 = sshll.u32 %s1461_s15, 8 }
  0x6c   : > { %s1021_s25 = sshll.u32 %s333_s1, 5  ;;  %p1813_p0 = scmp.ne.s32.totalorder %s1805_s19, 0 }
  0x6d   : > { %s346_s9 = scalar_lea.hbm %s1783_s0, %s1057_s10  ;;  %s337_s18 = scalar_lea.vmem [#allocation4], %s1021_s25 }
  0x6e   : > { %s1168_s27 = scalar_select %p1813_p0, [#allocation0], [#allocation15] }
  0x6f   : > { %s359_s20 = sshll.u32 %s337_s18, 4  ;;  %s1474_s28 = smov 512   ;;  %s360_s20 = int_to_ptr.vmem [resolvable:$true] %s359_s20 }
  0x70   : > { %s351_s7 = sld [smem:[%s1168_s27]]   ;;  %s1475_s30 = smov 256  }
  0x71   : > { %1169 = sst [smem:[#allocation14]] (%p1813_p0), %s1474_s28  ;;  %s1476_s26 = smov 4  }
  0x72   : > { %1170 = sst [smem:[#allocation14 + $0x1]] (%p1813_p0), %s1475_s30  ;;  %s1477_s29 = smov 64  }
  0x73   : > { %1171 = sst [smem:[#allocation14 + $0x2]] (%p1813_p0), %s1476_s26  ;;  %s334_s25 = scalar_lea.sflag [#allocation5], %s333_s1 }
  0x74   : > { %1172 = sst [smem:[#allocation14 + $0x3]] (%p1813_p0), %s1477_s29  ;;  %s1478_s10 = smov [#allocation13]  }
  0x75   : > { %1173 = sst [smem:[#allocation14 + $0x4]] (%p1813_p0), %s1477_s29 }
  0x76   : > { %s1024_s17 = sshll.u32 %s351_s7, 26  ;;  %1174 = sst [smem:[#allocation14 + $0x5]] (%p1813_p0), %s1476_s26 }
  0x77   : > { %s1025_s23 = sadd.s32 134217728, %s1024_s17 }
  0x78   : > { %1175 = dma.general (%p1813_p0), %s346_s9, 512, %s360_s20, %s334_s25, %s1478_s10, [#allocation14], %s1025_s23, 0  }
  0x79 PF: > { %p1814_p12 = scmp.ne.s32.totalorder %s1809_s24, 0 }
  0x7a   : > { %s386_s27 = sand.u32 (!%p1814_p12), 1, %s1449_s12   ;;  %p1815_p5 = scmp.ne.s32.totalorder (!%p1814_p12), %s1807_s22, 0 }
  0x7b   : > { %384 = sbr.rel (%p1814_p12) target bundleno = 1329 (0x531), region = 56  ;;  %s1027_s8 = sshll.u32 (!%p1814_p12), %s386_s27, 5 }
  0x7c   : > { %s387_s11 = scalar_lea.sflag (!%p1814_p12), [#allocation5], %s386_s27  ;;  %s1705_s18 = scalar_lea.vmem (!%p1814_p12), [#allocation4], %s1027_s8 }
  0x82   : > { %1428 = dma.done.wait (%p1815_p5), %s387_s11, 512  }
  0x83   : > { %1430 = vsyncadd (%p1815_p5), %s387_s11, 4294966784  ;;  %p1816_p3 = scmp.ne.s32.totalorder %s1806_s21, 0 }
  0x85   : > { %1432 = dma.done.wait (%p1816_p3), [#allocation8], 1536  }
  0x86   : > { %1434 = vsyncadd (%p1816_p3), [#allocation8], 4294965760 }
  0x87   : > { %1436 = dma.done.wait (%p1816_p3), [#allocation11], 512  }
  0x88   : > { %1438 = vsyncadd (%p1816_p3), [#allocation11], 4294966784  ;;  %p1031_p8 = scmp.ne.s32.totalorder %s1457_s14, 0 }
  0x89   : > { %v1479_v1 = vmov (!%p1031_p8), 0.0  }
  0x8a   : > { %438 = sbr.rel (%p1031_p8) target bundleno = 145 (0x91), region = 76  ;;  %439 = vst [vmem:[#allocation2] sm:$0x3] (!%p1031_p8), %v1479_v1 }
  0x91 PF: > { %v1274_v2 = vld [vmem:[#allocation7] sm:$0xff]   ;;  %v1275_v3 = vld [vmem:[#allocation7 + $0x8] sm:$0xff]   ;;  %v1276_v4 = vld [vmem:[#allocation7 + $0x10] sm:$0xff]   ;;  %vm597_vm0 = vcmask 1041409   ;;  %p1045_p10 = scmp.ne.s32.totalorder %s1457_s14, 1 }
  0x92   : > { %1088 = vmatprep.subr.bf16.mxu0 %v1274_v2  ;;  %1108 = vmatprep.subr.bf16.mxu1 %v1274_v2  ;;  %v1277_v5 = vld [vmem:[#allocation7 + $0x18] sm:$0xff]   ;;  %v1282_v6 = vld [vmem:[%s1705_s18] sm:$0xff]   ;;  %v1284_v7 = vld [vmem:[%s1705_s18 + $0x8] sm:$0xff]   ;;  %s1480_s22 = smov (!%p1045_p10), 96   ;;  %s1481_s24 = smov (!%p1045_p10), 32   ;;  %vm1484_vm1 = vmmov (!%p1045_p10), 0  }
  0x93   : > { %1089 = vmatpush3.bf16.msra.mxu0 %v1274_v2  ;;  %1109 = vmatpush3.bf16.msra.mxu1 %v1274_v2  ;;  %v1278_v8 = vld [vmem:[#allocation7 + $0x20] sm:$0xff]   ;;  %v1279_v9 = vld [vmem:[#allocation7 + $0x28] sm:$0xff]   ;;  %v1280_v10 = vld [vmem:[#allocation7 + $0x30] sm:$0xff]   ;;  %s1482_s1 = smov (!%p1045_p10), 64   ;;  %vm727_vm2 = vcmask (!%p1045_p10), 261120   ;;  %s1817_s26 = sld [smem:[#allocation23_spill]] (!%p1045_p10) }
  0x94   : > { %1090 = vmatprep.subr.bf16.mxu0 %v1275_v3  ;;  %1110 = vmatprep.subr.bf16.mxu1 %v1275_v3  ;;  %v1281_v11 = vld [vmem:[#allocation7 + $0x38] sm:$0xff]   ;;  %v1283_v12 = vld [vmem:[%s1705_s18 + $0x10] sm:$0xff]   ;;  %vm895_vm3 = vcmask (!%p1045_p10), 254976  }
  0x95   : > { %1104 = vmatprep.mubr.bf16.mxu0 %v1282_v6  ;;  %1124 = vmatprep.mubr.bf16.mxu1 %v1284_v7  ;;  %v1285_v13 = vld [vmem:[%s1705_s18 + $0x18] sm:$0xff]  }
  0x96   : > { %v1032_v14 = vld [vmem:[%s1785_s2] ss:$0 sm:$0xff] }
  0x97   : > { %1091 = vmatpush3.bf16.msra.mxu0 %v1275_v3  ;;  %1111 = vmatpush3.bf16.msra.mxu1 %v1275_v3  ;;  %v580_v1 = vld [vmem:[#allocation2] sm:$0x3] }
  0x98   : > { %1092 = vmatprep.subr.bf16.mxu0 %v1276_v4  ;;  %1112 = vmatprep.subr.bf16.mxu1 %v1276_v4 }
  0x9b   : > { %1093 = vmatpush3.bf16.msra.mxu0 %v1276_v4  ;;  %1113 = vmatpush3.bf16.msra.mxu1 %v1276_v4 }
  0x9c   : > { %1094 = vmatprep.subr.bf16.mxu0 %v1277_v5  ;;  %1114 = vmatprep.subr.bf16.mxu1 %v1277_v5 }
  0x9f   : > { %1095 = vmatpush3.bf16.msra.mxu0 %v1277_v5  ;;  %1115 = vmatpush3.bf16.msra.mxu1 %v1277_v5 }
  0xa0   : > { %1096 = vmatprep.subr.bf16.mxu0 %v1278_v8  ;;  %1116 = vmatprep.subr.bf16.mxu1 %v1278_v8 }
  0xa3   : > { %1097 = vmatpush3.bf16.msra.mxu0 %v1278_v8  ;;  %1117 = vmatpush3.bf16.msra.mxu1 %v1278_v8 }
  0xa4   : > { %1098 = vmatprep.subr.bf16.mxu0 %v1279_v9  ;;  %1118 = vmatprep.subr.bf16.mxu1 %v1279_v9 }
  0xa7   : > { %1099 = vmatpush3.bf16.msra.mxu0 %v1279_v9  ;;  %1119 = vmatpush3.bf16.msra.mxu1 %v1279_v9 }
  0xa8   : > { %1100 = vmatprep.subr.bf16.mxu0 %v1280_v10  ;;  %1120 = vmatprep.subr.bf16.mxu1 %v1280_v10 }
  0xab   : > { %1101 = vmatpush3.bf16.msra.mxu0 %v1280_v10  ;;  %1121 = vmatpush3.bf16.msra.mxu1 %v1280_v10  ;;  %v716_v10 = vld [vmem:[#allocation9] sm:$0xff] (!%p1045_p10) }
  0xac   : > { %1102 = vmatprep.subr.bf16.mxu0 %v1281_v11  ;;  %1122 = vmatprep.subr.bf16.mxu1 %v1281_v11 }
  0xaf   : > { %1103 = vmatpush3.bf16.msra.mxu0 %v1281_v11  ;;  %1123 = vmatpush3.bf16.msra.mxu1 %v1281_v11  ;;  %v717_v11 = vld [vmem:[#allocation9 + $0x8] sm:$0xff] (!%p1045_p10) }
  0xb2   : > { %1105 = vmatmul.mubr.bf16.vlgmr.msra.gmra.mrb[0].mxu0 %v1283_v12  ;;  %1125 = vmatmul.mubr.bf16.vlgmr.msra.gmra.mrb[0].mxu1 %v1285_v13  ;;  %v718_v12 = vld [vmem:[#allocation9 + $0x10] sm:$0xff] (!%p1045_p10)  ;;  %v1483_v13 = vmov (!%p1045_p10), 0.0|0.0  }
  0xb3   : > { %1150 = vmatprep.subr.bf16.mxu0 (!%p1045_p10), %v1483_v13  ;;  %1156 = vmatprep.subr.bf16.mxu1 (!%p1045_p10), %v1483_v13 }
 0x185   : > { %v1106_v15 = vpop.f32.mrb[0].mxu0  ;;  %v1126_v16 = vpop.f32.mrb[0].mxu1 }
 0x186   : > { %v570_v17 = vadd.f32 %v1106_v15, %v1032_v14  ;;  %v561_v18 = vpop.f32.mrb[1].mxu0  ;;  %v661_v19 = vadd.f32 %v1126_v16, %v1032_v14  ;;  %v652_v20 = vpop.f32.mrb[1].mxu1  ;;  %v719_v15 = vld [vmem:[#allocation9 + $0x18] sm:$0xff] (!%p1045_p10)  ;;  %v1485_v16 = vmov (!%p1045_p10), 0.0  }
 0x187   : > { %v562_v21 = vadd.f32 %v1032_v14, %v561_v18  ;;  %v1107_v22 = vpop.f32.mrb[2].mxu0  ;;  %v653_v23 = vadd.f32 %v1032_v14, %v652_v20  ;;  %v1127_v24 = vpop.f32.mrb[2].mxu1  ;;  %1136 = vmatprep.mubr.msk.f32.mxu0 (!%p1045_p10), %vm1484_vm1, %v1485_v16  ;;  %1147 = vmatprep.mubr.msk.f32.mxu1 (!%p1045_p10), %vm1484_vm1, %v1485_v16  ;;  %v802_v18 = vld [vmem:[#allocation10] sm:$0xff] (!%p1045_p10) }
 0x188   : > { %v669_v25 = vmax.f32 %v661_v19, 0.0  ;;  %v573_v26 = vadd.f32 %v1107_v22, %v1032_v14  ;;  %v564_v27 = vpop.f32.mrb[3].mxu0  ;;  %v664_v28 = vadd.f32 %v1127_v24, %v1032_v14  ;;  %v655_v29 = vpop.f32.mrb[3].mxu1  ;;  %v578_v33 = vmax.f32 %v570_v17, 0.0  ;;  %v803_v19 = vld [vmem:[#allocation10 + $0x8] sm:$0xff] (!%p1045_p10) }
 0x189   : > { %v667_v30 = vmax.f32 %v653_v23, 0.0  ;;  %v565_v31 = vadd.f32 %v1032_v14, %v564_v27  ;;  %v656_v32 = vadd.f32 %v1032_v14, %v655_v29  ;;  %v576_v36 = vmax.f32 %v562_v21, 0.0 }
 0x18a   : > { %v579_v34 = vmax.f32 %v573_v26, 0.0  ;;  %v670_v35 = vmax.f32 %v664_v28, 0.0  ;;  %v1151_v14 = vpack.c.bf16 (!%p1045_p10), %v717_v11, %v716_v10  ;;  %v1154_v17 = vpack.c.bf16 (!%p1045_p10), %v719_v15, %v718_v12 }
 0x18b   : > { %v577_v37 = vmax.f32 %v565_v31, 0.0  ;;  %v668_v38 = vmax.f32 %v656_v32, 0.0  ;;  %v1157_v20 = vpack.c.bf16 (!%p1045_p10), %v803_v19, %v802_v18  ;;  %v804_v31 = vld [vmem:[#allocation10 + $0x10] sm:$0xff] (!%p1045_p10)  ;;  %v805_v32 = vld [vmem:[#allocation10 + $0x18] sm:$0xff] (!%p1045_p10) }
 0x18c   : > { %v588_v39 = vadd.f32 %v579_v34, %v578_v33  ;;  %v679_v40 = vadd.f32 %v670_v35, %v669_v25  ;;  %1152 = vmatpush3.bf16.msra.mxu0 (!%p1045_p10), %v1151_v14  ;;  %v1160_v33 = vpack.c.bf16 (!%p1045_p10), %v805_v32, %v804_v31  ;;  %v1047_v34 = vld [vmem:[%s1787_s4] ss:$0 sm:$0xff] (!%p1045_p10) }
 0x18d   : > { %v581_v41 = vadd.f32 %v577_v37, %v576_v36  ;;  %v672_v42 = vadd.f32 %v668_v38, %v667_v30  ;;  %1153 = vmatprep.subr.bf16.mxu0 (!%p1045_p10), %v1483_v13  ;;  %1158 = vmatpush3.bf16.msra.mxu1 (!%p1045_p10), %v1157_v20 }
 0x18e   : > { %v589_v43 = vrot.slane %v588_v39, 4  ;;  %v680_v44 = vrot.slane %v679_v40, 4  ;;  %1159 = vmatprep.subr.bf16.mxu1 (!%p1045_p10), %v1483_v13 }
 0x18f   : > { %v582_v45 = vrot.slane %v581_v41, 4  ;;  %v673_v46 = vrot.slane %v672_v42, 4 }
 0x190   : > { %v590_v47 = vadd.f32 %v589_v43, %v588_v39  ;;  %v681_v48 = vadd.f32 %v680_v44, %v679_v40  ;;  %1155 = vmatpush3.bf16.msra.mxu0 (!%p1045_p10), %v1154_v17  ;;  %v1049_v39 = vld [vmem:[%s1789_s6] ss:$0 sm:$0xff] (!%p1045_p10) }
 0x191   : > { %v583_v49 = vadd.f32 %v582_v45, %v581_v41  ;;  %v674_v50 = vadd.f32 %v673_v46, %v672_v42  ;;  %1161 = vmatpush3.bf16.msra.mxu1 (!%p1045_p10), %v1160_v33  ;;  %v1051_v43 = vld [vmem:[%s1817_s26] ss:$0 sm:$0xff] (!%p1045_p10) }
 0x192   : > { %v591_v51 = vrot.slane %v590_v47, 2  ;;  %v682_v52 = vrot.slane %v681_v48, 2 }
 0x193   : > { %v584_v53 = vrot.slane %v583_v49, 2  ;;  %v675_v54 = vrot.slane %v674_v50, 2 }
 0x194   : > { %v592_v55 = vadd.f32 %v591_v51, %v590_v47  ;;  %v683_v56 = vadd.f32 %v682_v52, %v681_v48  ;;  %v1486_v47 = vmov (!%p1045_p10), 0   ;;  %v1052_v48 = vld [vmem:[#allocation3] ss:$0 sm:$0xff] (!%p1045_p10) }
 0x195   : > { %v585_v57 = vadd.f32 %v584_v53, %v583_v49  ;;  %v676_v58 = vadd.f32 %v675_v54, %v674_v50  ;;  %1286 = vset.pattern.permute.xlu0 (!%p1045_p10), %v1486_v47 }
 0x196   : > { %v593_v59 = vrot.slane %v592_v55, 1  ;;  %v684_v60 = vrot.slane %v683_v56, 1 }
 0x197   : > { %v586_v61 = vrot.slane %v585_v57, 1  ;;  %v677_v62 = vrot.slane %v676_v58, 1 }
 0x198   : > { %v594_v63 = vadd.f32 %v593_v59, %v592_v55  ;;  %v685_v0 = vadd.f32 %v684_v60, %v683_v56 }
 0x199   : > { %v587_v2 = vadd.f32 %v586_v61, %v585_v57  ;;  %v678_v3 = vadd.f32 %v677_v62, %v676_v58 }
 0x19b   : > { %v598_v4 = vsel %vm597_vm0, %v594_v63, %v587_v2  ;;  %v688_v5 = vsel %vm597_vm0, %v685_v0, %v678_v3 }
 0x19c   : > { %v600_v6 = vadd.f32 %v598_v4, %v580_v1 }
 0x19e   : > { %601 = vst [vmem:[#allocation2] sm:$0x3] %v600_v6 }
 0x1a2   : > { %695 = sbr.rel (%p1045_p10) target bundleno = 1298 (0x512), region = 80 }
 0x1a5   : > { %v671_v7 = vld [vmem:[#allocation2] sm:$0x3] }
 0x1a6   : > { %v690_v8 = vadd.f32 %v688_v5, %v671_v7 }
 0x1a8   : > { %691 = vst [vmem:[#allocation2] sm:$0x3] %v690_v8 }
 0x1af   : > { %v696_v9 = vld [vmem:[#allocation2] sm:$0x3] }
 0x1b0   : > { %698 = vrot.lane.b32.xlu0 %v696_v9, %s1480_s22  ;;  %706 = vrot.lane.b32.xlu1 %v696_v9, %s1481_s24 }
 0x1b4   : > { %702 = vrot.lane.b32.xlu0 %v696_v9, %s1482_s1 }
 0x222   : > { %v699_v21 = vpop.permute.xlu0 %698  ;;  %v707_v24 = vpop.permute.xlu1 %706 }
 0x223   : > { %v701_v22 = vadd.f32 %v699_v21, %v696_v9 }
 0x226   : > { %v703_v23 = vpop.permute.xlu0 %702 }
 0x227   : > { %v705_v25 = vadd.f32 %v703_v23, %v701_v22 }
 0x229   : > { %v709_v26 = vadd.f32 %v707_v24, %v705_v25 }
 0x22b   : > { %v1046_v27 = vmul.f32 -1.442695, %v709_v26 }
 0x22d   : > { %1287 = vpow2.f32 %v1046_v27 }
 0x237   : > { %v1288_v28 = vpop.eup %1287 }
 0x238   : > { %v713_v29 = vadd.f32 1.0, %v1288_v28 }
 0x23a   : > { %1289 = vrcp.f32 %v713_v29 }
 0x244   : > { %v1290_v30 = vpop.eup %1289 }
 0x245   : > { %1137 = vmatmul.mubr.msk.f32.vlgmr.msra.gmra.mrb[0].mxu0 %vm727_vm2, %v1290_v30 }
 0x318   : > { %v797_v35 = vpop.f32.mrb[0].mxu0 }
 0x319   : > { %v798_v36 = vadd.f32 %v1047_v34, %v797_v35  ;;  %v1138_v37 = vpop.f32.mrb[1].mxu0 }
 0x31b   : > { %v801_v38 = vmax.f32 %v798_v36, 0.0 }
 0x31d   : > { %1148 = vmatmul.mubr.msk.f32.vlgmr.msra.gmra.mrb[0].mxu1 %vm727_vm2, %v801_v38 }
 0x3f0   : > { %v882_v40 = vpop.f32.mrb[0].mxu1 }
 0x3f1   : > { %v883_v41 = vadd.f32 %v1049_v39, %v882_v40  ;;  %v1149_v42 = vpop.f32.mrb[1].mxu1 }
 0x3f3   : > { %1291 = vtanh.f32 %v883_v41 }
 0x3fd   : > { %v1292_v44 = vpop.eup %1291 }
 0x3fe   : > { %v894_v45 = vmul.f32 %v1292_v44, %v1051_v43 }
 0x400   : > { %v896_v46 = vsel %vm895_vm3, %v894_v45, 0.0 }
 0x401   : > { %897 = vadd.xlane.f32.xlu1 %v896_v46 }
 0x48e   : > { %v898_v49 = vpop.xlane.xlu1 %897 }
 0x48f   : > { %v906_v50 = vadd.f32 %v1052_v48, %v898_v49 }
 0x491   : > { %909 = vperm.xlu0 %1286, %v906_v50  }
 0x510   : > { %v910_v51 = vpop.permute.xlu0 %909 }
 0x511   : > { %912 = vst [vmem:[#allocation12] sm:$0x3] %v910_v51 }
 0x512 PF: > { %s1818_s29 = sadd.s32 4294967295, %s1465_s16   ;;  %s1487_s23 = smov [#allocation12]  }
 0x513   : > { %p1739_p1 = scmp.eq.s32.totalorder %s1818_s29, 1  ;;  %s922_s25 = sshll.u32 %s1487_s23, 4  ;;  %s923_s25 = int_to_ptr.vmem [resolvable:$true] %s922_s25 }
 0x514   : > { %s1377_s10 = scalar_lea.vmem %s923_s25, 32  ;;  %p1384_p7 = scmp.lt.s32.totalorder %s923_s25, %s923_s25 }
 0x515   : > { %p1378_p2 = scmp.ne.s32.totalorder %s923_s25, %s1377_s10  ;;  %p1385_p9 = scmp.lt.s32.totalorder %s1377_s10, %s1377_s10 }
 0x517   : > { %p1379_p4 = pnand %p1378_p2, %p1739_p1  ;;  %p1386_p11 = por %p1385_p9, %p1384_p7 }
 0x519   : > { %p1380_p6 = pneg %p1379_p4 }
 0x51b   : > { %p1387_p13 = pnand %p1386_p11, %p1380_p6 }
 0x51d   : > { %1390 = shalt.err (!%p1387_p13)
}
 0x51e   : > { %s1820_s11 = sld [smem:[#allocation24_spill]] }
 0x524   : > { %s1821_s18 = smov %s1820_s11  ;;  %s1391_s19 = scalar_lea.hbm %s1820_s11, 32 }
 0x525   : > { %p1392_p0 = scmp.ne.s32.totalorder %s1821_s18, %s1391_s19  ;;  %p1397_p3 = scmp.lt.u32.totalorder %s1391_s19, %s1821_s18 }
 0x527   : > { %p1393_p12 = pnand %p1392_p0, %p1739_p1 }
 0x529   : > { %p1394_p5 = pneg %p1393_p12 }
 0x52b   : > { %p1399_p8 = pnand %p1397_p3, %p1394_p5 }
 0x52d   : > { %1402 = shalt.err (!%p1399_p8)
}
 0x52e   : > { %1184 = dma.vmem_to_hbm [thread:$0]  (%p1739_p1), %s923_s25, 32, %s1821_s18, [#allocation6]  }
 0x52f   : > { %1440 = dma.done.wait (%p1739_p1), [#allocation6], 32  }
 0x530   : > { %1442 = vsyncadd (%p1739_p1), [#allocation6], 4294967264 }
 0x531 PF: > { %s27_s16 = sadd.s32 1, %s1465_s16   ;;  %s1822_s7 = sld [smem:[#allocation21_spill]] }
 0x532   : > { %p24_p10 = scmp.ge.s32.totalorder %s27_s16, 4   ;;  %s1823_s20 = sld [smem:[#allocation20_spill]] }
 0x533   : > { %s1824_s11 = smov %s1449_s12  ;;  %s1825_s12 = smov %s1453_s13 }
 0x534   : > { %s1827_s14 = smov %s1461_s15  ;;  %26 = sbr.rel (!%p24_p10) target bundleno = 11 (0xb), region = 119 }
 0x537   : > { %s1826_s13 = smov %s1822_s7 }
 0x538   : > { %s1828_s15 = smov %s1823_s20 }
 0x53b   :  { %935 = vsyncpa [#allocation5], 1 }
 0x53c   :  { %937 = vsyncpa [#allocation5 + $0x1], 1 }
 0x53d   :  { %938 = vsyncpa [#allocation8], 1 }
 0x53e   :  { %939 = vsyncpa [#allocation11], 1 }
 0x53f   :  { %940 = vsyncpa [#allocation6], 1 }
 0x540   :  { %942 = vsyncpa [#allocation6 + $0x1], 1 }

</bundles_post_ra>
